<compile_context>
chip_gen: v7x
topology: tpu7x:2x2x1
jax: 0.10.0
libtpu: 0.0.40
codegen_flags: <defaults>
</compile_context>

<pallas_src>
import math
import functools

import jax
import jax.numpy as jnp
from jax.experimental import pallas as pl
from jax.experimental.pallas import tpu as pltpu

d_model = 8

example = ('Hello! This is an example of a paragraph that has been split into '
           'its basic components. I wonder what will come next! Any guesses?')


def tokenize(sequence):
    for punc in ['!', '.', '?', ',']:
        sequence = sequence.replace(punc, '')
    return [token.lower() for token in sequence.split(' ')]


def build_vocab(data):
    vocab = list(set(tokenize(data)))
    vocab.sort()
    return {word: idx for idx, word in enumerate(vocab)}


stoi = build_vocab(example)
vocab_size = len(stoi) + 1  # matches the PyTorch module's vocab_size


def embed_gather_kernel(ids_ref, lut_ref, o_ref, *, tm, scale):
    """Gather `tm` embedding rows for one output tile.

    ids_ref: SMEM (N_pad,) int32   -- scalar-prefetched token ids
    lut_ref: VMEM (V, 1, D) f32    -- full table, resident across the grid
    o_ref:   VMEM (tm, D)  f32     -- one token tile of the (N_pad, D) output
    """
    base = pl.program_id(0) * tm
    for i in range(tm):                     # static, unrolled
        tok = ids_ref[base + i]             # scalar read from SMEM
        row = lut_ref[tok]                  # (1, D) dynamic row load (untiled axis)
        o_ref[pl.ds(i, 1), :] = (row * scale).astype(o_ref.dtype)


def embeddings_forward(x, lut, *, tm=8):
    """x: (B, S) integer token ids; lut: (V, D) float32 embedding table."""
    B, S = x.shape
    V, D = lut.shape
    N = B * S
    assert tm % 8 == 0, "token tile must be a multiple of 8 sublanes"

    n_tiles = pl.cdiv(N, tm)
    n_pad = n_tiles * tm

    # Flatten + clamp ids (PyTorch nn.Embedding would raise on OOB ids; we
    # clamp so the kernel can never read out-of-bounds VMEM).
    ids = jnp.clip(x.reshape(N).astype(jnp.int32), 0, V - 1)
    if n_pad != N:
        ids = jnp.pad(ids, (0, n_pad - N))

    # Leading-axis layout so the dynamic token index hits an untiled dim.
    lut3 = lut.reshape(V, 1, D)

    kernel = functools.partial(embed_gather_kernel, tm=tm, scale=math.sqrt(D))

    out2d = pl.pallas_call(
        kernel,
        out_shape=jax.ShapeDtypeStruct((n_pad, D), lut.dtype),
        grid_spec=pltpu.PrefetchScalarGridSpec(
            num_scalar_prefetch=1,          # ids -> SMEM, visible to index_maps
            grid=(n_tiles,),
            in_specs=[
                # Full LUT; constant block index -> stays resident in VMEM
                # across the whole grid (no re-DMA per tile).
                pl.BlockSpec((V, 1, D), lambda t, ids_s: (0, 0, 0)),
            ],
            out_specs=pl.BlockSpec((tm, D), lambda t, ids_s: (t, 0)),
        ),
        compiler_params=pltpu.CompilerParams(
            # Token tiles are independent -> shard loop across v7x's 2 TCs.
            dimension_semantics=("parallel",),
            # Tiny footprint (LUT ~1 KiB + double-buffered (tm, D) tiles);
            # 16 MiB leaves ample headroom even on v7x's 64 MiB VMEM.
            vmem_limit_bytes=16 * 1024 * 1024,
        ),
    )(ids, lut3)

    # Layout plumbing (drop padding, restore (B, S, D)) in the wrapper.
    return out2d[:N].reshape(B, S, D)


if __name__ == "__main__":
    key = jax.random.PRNGKey(0)
    k_lut, k_ids = jax.random.split(key)

    batch, seq = 2, 8
    # nn.Embedding default init ~ N(0, 1): deterministic synthetic weights.
    lut = jax.random.normal(k_lut, (vocab_size, d_model), dtype=jnp.float32)
    x = jax.random.randint(k_ids, (batch, seq), 0, vocab_size, dtype=jnp.int32)

    out = embeddings_forward(x, lut)
    out = jax.block_until_ready(out)

    # Reference check (plain JAX) against the PyTorch semantics.
    ref = jnp.take(lut, x, axis=0) * math.sqrt(d_model)
    assert out.shape == (batch, seq, d_model)
    assert jnp.allclose(out, ref, atol=1e-5, rtol=1e-5)

    print("KERNEL_OK")
</pallas_src>

<mosaic_0001>
module attributes {stable_mosaic.version = 11 : i64} {
  func.func @embed_gather_kernel(%arg0: i32, %arg1: memref<16xi32, #tpu.memory_space<smem>>, %arg2: memref<25x1x8xf32, #tpu.memory_space<vmem>>, %arg3: memref<8x8xf32, #tpu.memory_space<vmem>>) attributes {dimension_semantics = [#tpu.dimension_semantics<parallel>], iteration_bounds = array<i64: 2>, scalar_prefetch = 1 : i64, scratch_operands = 0 : i64, tpu.core_type = #tpu.core_type<tc>, window_params = [{pipeline_mode = #tpu.pipeline_mode<synchronous>, transform_indices = @transform_0, window_bounds = array<i64: 25, 1, 8>}, {transform_indices = @transform_1, window_bounds = array<i64: 8, 8>}]} {
    %c8_i32 = arith.constant 8 : i32
    %0 = arith.muli %arg0, %c8_i32 : i32
    %c0_i32 = arith.constant 0 : i32
    %1 = arith.addi %0, %c0_i32 : i32
    %2 = arith.index_cast %1 : i32 to index
    %3 = memref.load %arg1[%2] : memref<16xi32, #tpu.memory_space<smem>>
    %4 = arith.index_cast %3 : i32 to index
    %c0 = arith.constant 0 : index
    %c0_0 = arith.constant 0 : index
    %5 = vector.load %arg2[%4, %c0, %c0_0] : memref<25x1x8xf32, #tpu.memory_space<vmem>>, vector<1x1x8xf32>
    %6 = vector.shape_cast %5 : vector<1x1x8xf32> to vector<1x8xf32>
    %cst = arith.constant 2.82842708 : f32
    %7 = vector.broadcast %cst : f32 to vector<1x8xf32>
    %8 = arith.mulf %6, %7 : vector<1x8xf32>
    %c0_1 = arith.constant 0 : index
    %c0_2 = arith.constant 0 : index
    %9 = vector.load %arg3[%c0_1, %c0_2] : memref<8x8xf32, #tpu.memory_space<vmem>>, vector<1x8xf32>
    tpu.vector_store %arg3[%c0_1, %c0_2], %8 {strides = array<i32>} : memref<8x8xf32, #tpu.memory_space<vmem>>, vector<1x8xf32>,
    %c1_i32 = arith.constant 1 : i32
    %10 = arith.addi %0, %c1_i32 : i32
    %11 = arith.index_cast %10 : i32 to index
    %12 = memref.load %arg1[%11] : memref<16xi32, #tpu.memory_space<smem>>
    %13 = arith.index_cast %12 : i32 to index
    %c0_3 = arith.constant 0 : index
    %c0_4 = arith.constant 0 : index
    %14 = vector.load %arg2[%13, %c0_3, %c0_4] : memref<25x1x8xf32, #tpu.memory_space<vmem>>, vector<1x1x8xf32>
    %15 = vector.shape_cast %14 : vector<1x1x8xf32> to vector<1x8xf32>
    %cst_5 = arith.constant 2.82842708 : f32
    %16 = vector.broadcast %cst_5 : f32 to vector<1x8xf32>
    %17 = arith.mulf %15, %16 : vector<1x8xf32>
    %c1 = arith.constant 1 : index
    %c0_6 = arith.constant 0 : index
    %18 = vector.load %arg3[%c1, %c0_6] : memref<8x8xf32, #tpu.memory_space<vmem>>, vector<1x8xf32>
    tpu.vector_store %arg3[%c1, %c0_6], %17 {strides = array<i32>} : memref<8x8xf32, #tpu.memory_space<vmem>>, vector<1x8xf32>,
    %c2_i32 = arith.constant 2 : i32
    %19 = arith.addi %0, %c2_i32 : i32
    %20 = arith.index_cast %19 : i32 to index
    %21 = memref.load %arg1[%20] : memref<16xi32, #tpu.memory_space<smem>>
    %22 = arith.index_cast %21 : i32 to index
    %c0_7 = arith.constant 0 : index
    %c0_8 = arith.constant 0 : index
    %23 = vector.load %arg2[%22, %c0_7, %c0_8] : memref<25x1x8xf32, #tpu.memory_space<vmem>>, vector<1x1x8xf32>
    %24 = vector.shape_cast %23 : vector<1x1x8xf32> to vector<1x8xf32>
    %cst_9 = arith.constant 2.82842708 : f32
    %25 = vector.broadcast %cst_9 : f32 to vector<1x8xf32>
    %26 = arith.mulf %24, %25 : vector<1x8xf32>
    %c2 = arith.constant 2 : index
    %c0_10 = arith.constant 0 : index
    %27 = vector.load %arg3[%c2, %c0_10] : memref<8x8xf32, #tpu.memory_space<vmem>>, vector<1x8xf32>
    tpu.vector_store %arg3[%c2, %c0_10], %26 {strides = array<i32>} : memref<8x8xf32, #tpu.memory_space<vmem>>, vector<1x8xf32>,
    %c3_i32 = arith.constant 3 : i32
    %28 = arith.addi %0, %c3_i32 : i32
    %29 = arith.index_cast %28 : i32 to index
    %30 = memref.load %arg1[%29] : memref<16xi32, #tpu.memory_space<smem>>
    %31 = arith.index_cast %30 : i32 to index
    %c0_11 = arith.constant 0 : index
    %c0_12 = arith.constant 0 : index
    %32 = vector.load %arg2[%31, %c0_11, %c0_12] : memref<25x1x8xf32, #tpu.memory_space<vmem>>, vector<1x1x8xf32>
    %33 = vector.shape_cast %32 : vector<1x1x8xf32> to vector<1x8xf32>
    %cst_13 = arith.constant 2.82842708 : f32
    %34 = vector.broadcast %cst_13 : f32 to vector<1x8xf32>
    %35 = arith.mulf %33, %34 : vector<1x8xf32>
    %c3 = arith.constant 3 : index
    %c0_14 = arith.constant 0 : index
    %36 = vector.load %arg3[%c3, %c0_14] : memref<8x8xf32, #tpu.memory_space<vmem>>, vector<1x8xf32>
    tpu.vector_store %arg3[%c3, %c0_14], %35 {strides = array<i32>} : memref<8x8xf32, #tpu.memory_space<vmem>>, vector<1x8xf32>,
    %c4_i32 = arith.constant 4 : i32
    %37 = arith.addi %0, %c4_i32 : i32
    %38 = arith.index_cast %37 : i32 to index
    %39 = memref.load %arg1[%38] : memref<16xi32, #tpu.memory_space<smem>>
    %40 = arith.index_cast %39 : i32 to index
    %c0_15 = arith.constant 0 : index
    %c0_16 = arith.constant 0 : index
    %41 = vector.load %arg2[%40, %c0_15, %c0_16] : memref<25x1x8xf32, #tpu.memory_space<vmem>>, vector<1x1x8xf32>
    %42 = vector.shape_cast %41 : vector<1x1x8xf32> to vector<1x8xf32>
    %cst_17 = arith.constant 2.82842708 : f32
    %43 = vector.broadcast %cst_17 : f32 to vector<1x8xf32>
    %44 = arith.mulf %42, %43 : vector<1x8xf32>
    %c4 = arith.constant 4 : index
    %c0_18 = arith.constant 0 : index
    %45 = vector.load %arg3[%c4, %c0_18] : memref<8x8xf32, #tpu.memory_space<vmem>>, vector<1x8xf32>
    tpu.vector_store %arg3[%c4, %c0_18], %44 {strides = array<i32>} : memref<8x8xf32, #tpu.memory_space<vmem>>, vector<1x8xf32>,
    %c5_i32 = arith.constant 5 : i32
    %46 = arith.addi %0, %c5_i32 : i32
    %47 = arith.index_cast %46 : i32 to index
    %48 = memref.load %arg1[%47] : memref<16xi32, #tpu.memory_space<smem>>
    %49 = arith.index_cast %48 : i32 to index
    %c0_19 = arith.constant 0 : index
    %c0_20 = arith.constant 0 : index
    %50 = vector.load %arg2[%49, %c0_19, %c0_20] : memref<25x1x8xf32, #tpu.memory_space<vmem>>, vector<1x1x8xf32>
    %51 = vector.shape_cast %50 : vector<1x1x8xf32> to vector<1x8xf32>
    %cst_21 = arith.constant 2.82842708 : f32
    %52 = vector.broadcast %cst_21 : f32 to vector<1x8xf32>
    %53 = arith.mulf %51, %52 : vector<1x8xf32>
    %c5 = arith.constant 5 : index
    %c0_22 = arith.constant 0 : index
    %54 = vector.load %arg3[%c5, %c0_22] : memref<8x8xf32, #tpu.memory_space<vmem>>, vector<1x8xf32>
    tpu.vector_store %arg3[%c5, %c0_22], %53 {strides = array<i32>} : memref<8x8xf32, #tpu.memory_space<vmem>>, vector<1x8xf32>,
    %c6_i32 = arith.constant 6 : i32
    %55 = arith.addi %0, %c6_i32 : i32
    %56 = arith.index_cast %55 : i32 to index
    %57 = memref.load %arg1[%56] : memref<16xi32, #tpu.memory_space<smem>>
    %58 = arith.index_cast %57 : i32 to index
    %c0_23 = arith.constant 0 : index
    %c0_24 = arith.constant 0 : index
    %59 = vector.load %arg2[%58, %c0_23, %c0_24] : memref<25x1x8xf32, #tpu.memory_space<vmem>>, vector<1x1x8xf32>
    %60 = vector.shape_cast %59 : vector<1x1x8xf32> to vector<1x8xf32>
    %cst_25 = arith.constant 2.82842708 : f32
    %61 = vector.broadcast %cst_25 : f32 to vector<1x8xf32>
    %62 = arith.mulf %60, %61 : vector<1x8xf32>
    %c6 = arith.constant 6 : index
    %c0_26 = arith.constant 0 : index
    %63 = vector.load %arg3[%c6, %c0_26] : memref<8x8xf32, #tpu.memory_space<vmem>>, vector<1x8xf32>
    tpu.vector_store %arg3[%c6, %c0_26], %62 {strides = array<i32>} : memref<8x8xf32, #tpu.memory_space<vmem>>, vector<1x8xf32>,
    %c7_i32 = arith.constant 7 : i32
    %64 = arith.addi %0, %c7_i32 : i32
    %65 = arith.index_cast %64 : i32 to index
    %66 = memref.load %arg1[%65] : memref<16xi32, #tpu.memory_space<smem>>
    %67 = arith.index_cast %66 : i32 to index
    %c0_27 = arith.constant 0 : index
    %c0_28 = arith.constant 0 : index
    %68 = vector.load %arg2[%67, %c0_27, %c0_28] : memref<25x1x8xf32, #tpu.memory_space<vmem>>, vector<1x1x8xf32>
    %69 = vector.shape_cast %68 : vector<1x1x8xf32> to vector<1x8xf32>
    %cst_29 = arith.constant 2.82842708 : f32
    %70 = vector.broadcast %cst_29 : f32 to vector<1x8xf32>
    %71 = arith.mulf %69, %70 : vector<1x8xf32>
    %c7 = arith.constant 7 : index
    %c0_30 = arith.constant 0 : index
    %72 = vector.load %arg3[%c7, %c0_30] : memref<8x8xf32, #tpu.memory_space<vmem>>, vector<1x8xf32>
    tpu.vector_store %arg3[%c7, %c0_30], %71 {strides = array<i32>} : memref<8x8xf32, #tpu.memory_space<vmem>>, vector<1x8xf32>,
    return
  }
  func.func @transform_0(%arg0: i32, %arg1: memref<16xi32, #tpu.memory_space<smem>>) -> (i32, i32, i32) {
    %c0_i32 = arith.constant 0 : i32
    %c0_i32_0 = arith.constant 0 : i32
    %c0_i32_1 = arith.constant 0 : i32
    %c0_i32_2 = arith.constant 0 : i32
    return %c0_i32, %c0_i32_0, %c0_i32_1 : i32, i32, i32
  }
  func.func @transform_1(%arg0: i32, %arg1: memref<16xi32, #tpu.memory_space<smem>>) -> (i32, i32) {
    %c0_i32 = arith.constant 0 : i32
    %c0_i32_0 = arith.constant 0 : i32
    return %arg0, %c0_i32 : i32, i32
  }
}

</mosaic_0001>

<bundles_post_ra>
// kernel: tpu_custom_call.1
= control target key start
LH: loop header
LB: loop body
LE: loop exit
PB: predicated region body
PF: predicated region fallthrough
CT: control target
= control target key end

     0   :  { %s324_s0 = inlined_call_operand.vmem [shape: s32[16], index: 0, kind: input, shape index: {}]   ;;  %s325_s1 = inlined_call_operand.vmem [shape: f32[25,1,8], index: 1, kind: input, shape index: {}]   ;;  %s326_s2 = inlined_call_operand.vmem [shape: f32[16,8], index: 2, kind: output, shape index: {}]  }
   0x1   :  { %s7_s11 = sshll.u32 %s324_s0, 4  ;;  %s8_s11 = int_to_ptr.vmem [resolvable:$true] %s7_s11 }
   0x2   :  { %s217_s12 = scalar_lea.vmem %s8_s11, 16  ;;  %p222_p1 = scmp.lt.s32.totalorder %s8_s11, %s8_s11 }
   0x3   :  { %p218_p0 = scmp.ne.s32.totalorder %s8_s11, %s217_s12  ;;  %p223_p2 = scmp.lt.s32.totalorder %s217_s12, %s217_s12 }
   0x5   :  { %p224_p3 = por %p223_p2, %p222_p1 }
   0x7   :  { %p225_p4 = pnand %p224_p3, %p218_p0 }
   0x9   :  { %228 = shalt.err (!%p225_p4)  }
   0xa   :  { %s239_s13 = smov [#allocation3]  }
   0xb   :  { %10 = dma.vmem_to_smem %s8_s11, 16, %s239_s13, [#allocation2] }
   0xc   :  { %233 = dma.done.wait [#allocation2], 16 }
   0xd   :  { %234 = vsyncadd [#allocation2], 4294967280 }
   0xe   :  { %12 = sfence }
   0xf   :  { %s258_s14 = smov 0  }
  0x10 LB: > { %s200_s0 = sadd.s32 4294967295, %s237_s14   ;;  %p203_p5 = scmp.ge.s32.totalorder %s237_s14, 1  ;;  %s237_s14 = sphi %s258_s14, %s18_s14  }
  0x11   : > { %p84_p6 = scmp.lt.s32.totalorder %s237_s14, 3 }
  0x13   : > { %p85_p7 = pnand %p203_p5, %p84_p6 }
  0x14   : > { %p98_p8 = scmp.lt.s32.totalorder (!%p85_p7), %s200_s0, 1  ;;  %s266_s15 = sshll.u32 (!%p85_p7), %s200_s0, 3  ;;  %vm107_vm0 = vcmask (!%p85_p7), 57344  }
  0x15   : > { %88 = sbr.rel (%p85_p7) target bundleno = 44 (0x2c), region = 24  ;;  %s103_s16 = sld [smem:[#allocation3 + %s266_s15]] (!%p85_p7) }
  0x16   : > { %s109_s17 = sadd.s32 (!%p85_p7), 1, %s266_s15  ;;  %s115_s19 = sadd.s32 (!%p85_p7), 2, %s266_s15 }
  0x17   : > { %s110_s18 = sld [smem:[#allocation3 + %s109_s17]] (!%p85_p7)  ;;  %s121_s25 = sadd.s32 (!%p85_p7), 3, %s266_s15 }
  0x18   : > { %s116_s21 = sld [smem:[#allocation3 + %s115_s19]] (!%p85_p7)  ;;  %s127_s27 = sadd.s32 (!%p85_p7), 4, %s266_s15 }
  0x19   : > { %s122_s26 = sld [smem:[#allocation3 + %s121_s25]] (!%p85_p7)  ;;  %s133_s4 = sadd.s32 (!%p85_p7), 5, %s266_s15 }
  0x1a   : > { %s128_s3 = sld [smem:[#allocation3 + %s127_s27]] (!%p85_p7)  ;;  %s139_s5 = sadd.s32 (!%p85_p7), 6, %s266_s15 }
  0x1b   : > { %s104_s30 = scalar_lea.vmem (!%p85_p7), %s325_s1, %s103_s16  ;;  %s134_s9 = sld [smem:[#allocation3 + %s133_s4]] (!%p85_p7) }
  0x1c   : > { %s328_s0 = smov (!%p98_p8, %s200_s0), 1  ;;  %v105_v0 = vld [vmem:[%s104_s30] sm:$0x1]  ;;  %s140_s13 = sld [smem:[#allocation3 + %s139_s5]] }
  0x1d   : > { %s204_s20 = sshll.u32 %s328_s0, 3  ;;  %v106_v1 = vmul.f32 2.828427, %v105_v0  ;;  %s111_s8 = scalar_lea.vmem %s325_s1, %s110_s18 }
  0x1e   : > { %s274_s24 = scalar_lea.vmem %s326_s2, %s204_s20  ;;  %v112_v2 = vld [vmem:[%s111_s8] sm:$0x1]  ;;  %s117_s12 = scalar_lea.vmem %s325_s1, %s116_s21 }
  0x1f   : > { %108 = vst.msk [vmem:[%s274_s24] sm:$0x1] %vm107_vm0, %v106_v1  ;;  %v113_v3 = vmul.f32 2.828427, %v112_v2  ;;  %v118_v4 = vld [vmem:[%s117_s12] sm:$0x1]  ;;  %s123_s19 = scalar_lea.vmem %s325_s1, %s122_s26 }
  0x20   : > { %s145_s0 = sadd.s32 7, %s266_s15  ;;  %v119_v5 = vmul.f32 2.828427, %v118_v4  ;;  %v124_v6 = vld [vmem:[%s123_s19] sm:$0x1]  ;;  %s129_s22 = scalar_lea.vmem %s325_s1, %s128_s3 }
  0x21   : > { %s146_s18 = sld [smem:[#allocation3 + %s145_s0]]  ;;  %114 = vst.msk [vmem:[%s274_s24 + $0x1] sm:$0x1] %vm107_vm0, %v113_v3  ;;  %v125_v7 = vmul.f32 2.828427, %v124_v6  ;;  %s135_s25 = scalar_lea.vmem %s325_s1, %s134_s9 }
  0x22   : > { %120 = vst.msk [vmem:[%s274_s24 + $0x2] sm:$0x1] %vm107_vm0, %v119_v5  ;;  %v130_v8 = vld [vmem:[%s129_s22] sm:$0x1]  ;;  %s141_s28 = scalar_lea.vmem %s325_s1, %s140_s13 }
  0x23   : > { %v131_v9 = vmul.f32 2.828427, %v130_v8  ;;  %126 = vst.msk [vmem:[%s274_s24 + $0x3] sm:$0x1] %vm107_vm0, %v125_v7  ;;  %v136_v10 = vld [vmem:[%s135_s25] sm:$0x1] }
  0x24   : > { %v137_v11 = vmul.f32 2.828427, %v136_v10  ;;  %v142_v12 = vld [vmem:[%s141_s28] sm:$0x1] }
  0x25   : > { %132 = vst.msk [vmem:[%s274_s24 + $0x4] sm:$0x1] %vm107_vm0, %v131_v9  ;;  %v143_v13 = vmul.f32 2.828427, %v142_v12 }
  0x26   : > { %138 = vst.msk [vmem:[%s274_s24 + $0x5] sm:$0x1] %vm107_vm0, %v137_v11 }
  0x27   : > { %s147_s3 = scalar_lea.vmem %s325_s1, %s146_s18  ;;  %144 = vst.msk [vmem:[%s274_s24 + $0x6] sm:$0x1] %vm107_vm0, %v143_v13 }
  0x28   : > { %v148_v14 = vld [vmem:[%s147_s3] sm:$0x1] }
  0x29   : > { %v149_v15 = vmul.f32 2.828427, %v148_v14 }
  0x2b   : > { %150 = vst.msk [vmem:[%s274_s24 + $0x7] sm:$0x1] %vm107_vm0, %v149_v15 }
  0x2c PF: > { %s18_s14 = sadd.s32 1, %s237_s14  }
  0x2d   : > { %p15_p9 = scmp.ge.s32.totalorder %s18_s14, 4  }
  0x2f   :  { %17 = sbr.rel (!%p15_p9) target bundleno = 16 (0x10), region = 59 }

</bundles_post_ra>
